<compile_context>
chip_gen: v7x
topology: tpu7x:2x2x1
jax: 0.10.0
libtpu: 0.0.40
codegen_flags: <defaults>
</compile_context>

<pallas_src>
import jax
import jax.numpy as jnp
from jax.experimental import pallas as pl
from jax.experimental.pallas import tpu as pltpu


OUT_COLS = 10          # logits
OUT_PAD = 128          # lane-dense padded output width
DEFAULT_TILE_B = 256   # batch tile (comfortably inside scoped VMEM on all gens)


def mlp_kernel(x_ref, w1_ref, b1_ref, w2_ref, b2_ref, w3_ref, b3_ref, o_ref):
    # fc1: bf16 MXU inputs, f32 accumulate; bias + ReLU in f32.
    h1 = jnp.dot(x_ref[...], w1_ref[...], preferred_element_type=jnp.float32)
    h1 = jnp.maximum(h1 + b1_ref[...], 0.0)
    # fc2: cast the activation to bf16 only at the MXU input.
    h2 = jnp.dot(h1.astype(jnp.bfloat16), w2_ref[...],
                 preferred_element_type=jnp.float32)
    h2 = jnp.maximum(h2 + b2_ref[...], 0.0)
    # fc3: no activation; output is 128-lane padded (unmasked full-vreg stores).
    out = jnp.dot(h2.astype(jnp.bfloat16), w3_ref[...],
                  preferred_element_type=jnp.float32)
    o_ref[...] = (out + b3_ref[...]).astype(o_ref.dtype)


def _forward_small(x, w1t, b1, w2t, b2, w3t, b3):
    """Single-shot path for tiny batches: no grid, no pipeline machinery."""
    B = x.shape[0]
    vmem_spec = lambda: pl.BlockSpec(memory_space=pltpu.MemorySpace.VMEM)
    return pl.pallas_call(
        mlp_kernel,
        out_shape=jax.ShapeDtypeStruct((B, OUT_PAD), jnp.float32),
        in_specs=[vmem_spec() for _ in range(7)],
        out_specs=vmem_spec(),
    )(x, w1t, b1, w2t, b2, w3t, b3)


def _forward_tiled(x, w1t, b1, w2t, b2, w3t, b3, tile_b):
    """Batch-tiled path: pipelined x/out, VMEM-resident weights, parallel grid."""
    B, K = x.shape
    H = w1t.shape[1]
    nb = pl.cdiv(B, tile_b)
    b_pad = nb * tile_b
    if b_pad != B:
        x = jnp.pad(x, ((0, b_pad - B), (0, 0)))

    out = pl.pallas_call(
        mlp_kernel,
        out_shape=jax.ShapeDtypeStruct((b_pad, OUT_PAD), jnp.float32),
        grid=(nb,),
        in_specs=[
            pl.BlockSpec((tile_b, K), lambda i: (i, 0)),       # x: pipelined
            pl.BlockSpec((K, H), lambda i: (0, 0)),            # w1: resident
            pl.BlockSpec((1, H), lambda i: (0, 0)),            # b1: resident
            pl.BlockSpec((H, H), lambda i: (0, 0)),            # w2: resident
            pl.BlockSpec((1, H), lambda i: (0, 0)),            # b2: resident
            pl.BlockSpec((H, OUT_PAD), lambda i: (0, 0)),      # w3: resident
            pl.BlockSpec((1, OUT_PAD), lambda i: (0, 0)),      # b3: resident
        ],
        out_specs=pl.BlockSpec((tile_b, OUT_PAD), lambda i: (i, 0)),
        compiler_params=pltpu.CompilerParams(
            dimension_semantics=("parallel",),          # 2 TCs on v7x
            vmem_limit_bytes=32 * 1024 * 1024,
        ),
    )(x, w1t, b1, w2t, b2, w3t, b3)
    return out[:B]


def mnist_fully_connected_forward(x_nchw, params, *, tile_b=DEFAULT_TILE_B):
    """x_nchw: (B, 1, 28, 28) float32. params: PyTorch-convention tensors."""
    B = x_nchw.shape[0]
    # Flatten and cast MXU operands to bf16 (halves DMA bytes, native MXU path).
    x = x_nchw.reshape(B, -1).astype(jnp.bfloat16)                 # (B, 784)

    # nn.Linear stores W as (out, in); pre-transpose to (in, out) for x @ W_t.
    w1t = params["w1"].T.astype(jnp.bfloat16)                      # (784, H)
    w2t = params["w2"].T.astype(jnp.bfloat16)                      # (H, H)
    w3t = params["w3"].T.astype(jnp.bfloat16)                      # (H, 10)
    b1 = params["b1"].reshape(1, -1).astype(jnp.float32)           # (1, H)
    b2 = params["b2"].reshape(1, -1).astype(jnp.float32)           # (1, H)
    b3 = params["b3"].reshape(1, -1).astype(jnp.float32)           # (1, 10)

    # Lane-dense output: zero-pad the last layer from 10 -> 128 columns.
    w3t = jnp.pad(w3t, ((0, 0), (0, OUT_PAD - OUT_COLS)))          # (H, 128)
    b3 = jnp.pad(b3, ((0, 0), (0, OUT_PAD - OUT_COLS)))            # (1, 128)

    if B <= tile_b:
        out = _forward_small(x, w1t, b1, w2t, b2, w3t, b3)
    else:
        out = _forward_tiled(x, w1t, b1, w2t, b2, w3t, b3, tile_b)
    return out[:, :OUT_COLS]


def init_params(key, hidden_size):
    """Deterministic PyTorch-style uniform(-1/sqrt(fan_in), 1/sqrt(fan_in)) init."""
    ks = jax.random.split(key, 6)

    def lin(kw, kb, fan_in, fan_out):
        bound = 1.0 / jnp.sqrt(fan_in)
        w = jax.random.uniform(kw, (fan_out, fan_in), jnp.float32, -bound, bound)
        b = jax.random.uniform(kb, (fan_out,), jnp.float32, -bound, bound)
        return w, b

    w1, b1 = lin(ks[0], ks[1], 784, hidden_size)
    w2, b2 = lin(ks[2], ks[3], hidden_size, hidden_size)
    w3, b3 = lin(ks[4], ks[5], hidden_size, 10)
    return {"w1": w1, "b1": b1, "w2": w2, "b2": b2, "w3": w3, "b3": b3}


def reference_forward(x_nchw, params):
    """Pure-JAX f32 reference for correctness check."""
    x = x_nchw.reshape(x_nchw.shape[0], -1)
    h = jnp.maximum(x @ params["w1"].T + params["b1"], 0.0)
    h = jnp.maximum(h @ params["w2"].T + params["b2"], 0.0)
    return h @ params["w3"].T + params["b3"]


if __name__ == "__main__":
    key = jax.random.PRNGKey(0)
    k_param, k_x1, k_x2 = jax.random.split(key, 3)

    hidden_size = 32
    params = init_params(k_param, hidden_size)

    # --- tiny-batch path (no grid) ---
    batch = 2
    x = jax.random.normal(k_x1, (batch, 1, 28, 28), jnp.float32)   # NCHW
    out = mnist_fully_connected_forward(x, params)
    out = jax.block_until_ready(out)
    ref = reference_forward(x, params)
    assert out.shape == (batch, 10), out.shape
    # bf16 MXU inputs -> loosened tolerance vs pure-f32 reference.
    assert jnp.allclose(out, ref, atol=5e-2, rtol=5e-2), "small-path mismatch"

    # --- batch-tiled path (grid over batch, resident weights) ---
    big_batch = 320  # > TILE_B and not a multiple of it (exercises padding)
    xb = jax.random.normal(k_x2, (big_batch, 1, 28, 28), jnp.float32)
    outb = mnist_fully_connected_forward(xb, params)
    outb = jax.block_until_ready(outb)
    refb = reference_forward(xb, params)
    assert outb.shape == (big_batch, 10), outb.shape
    assert jnp.allclose(outb, refb, atol=5e-2, rtol=5e-2), "tiled-path mismatch"

    print("KERNEL_OK")
</pallas_src>

<mosaic_0001>
module attributes {stable_mosaic.version = 11 : i64} {
  func.func @mlp_kernel(%arg0: memref<2x784xbf16, #tpu.memory_space<vmem>>, %arg1: memref<784x32xbf16, #tpu.memory_space<vmem>>, %arg2: memref<1x32xf32, #tpu.memory_space<vmem>>, %arg3: memref<32x32xbf16, #tpu.memory_space<vmem>>, %arg4: memref<1x32xf32, #tpu.memory_space<vmem>>, %arg5: memref<32x128xbf16, #tpu.memory_space<vmem>>, %arg6: memref<1x128xf32, #tpu.memory_space<vmem>>, %arg7: memref<2x128xf32, #tpu.memory_space<vmem>>) attributes {dimension_semantics = [], scalar_prefetch = 0 : i64, scratch_operands = 0 : i64, tpu.core_type = #tpu.core_type<tc>} {
    %c0 = arith.constant 0 : index
    %c0_0 = arith.constant 0 : index
    %0 = vector.load %arg0[%c0, %c0_0] : memref<2x784xbf16, #tpu.memory_space<vmem>>, vector<2x784xbf16>
    %c0_1 = arith.constant 0 : index
    %c0_2 = arith.constant 0 : index
    %1 = vector.load %arg1[%c0_1, %c0_2] : memref<784x32xbf16, #tpu.memory_space<vmem>>, vector<784x32xbf16>
    %cst = arith.constant dense<0.000000e+00> : vector<2x32xf32>
    %2 = tpu.matmul %0, %1, %cst {dimension_numbers = #tpu.dot_dimension_numbers<[1], [0], [0], [1], [0, 0, 1, 1], [], []>} : vector<2x784xbf16>, vector<784x32xbf16>, vector<2x32xf32> -> vector<2x32xf32>
    %c0_3 = arith.constant 0 : index
    %c0_4 = arith.constant 0 : index
    %3 = vector.load %arg2[%c0_3, %c0_4] : memref<1x32xf32, #tpu.memory_space<vmem>>, vector<1x32xf32>
    %4 = vector.broadcast %3 : vector<1x32xf32> to vector<2x32xf32>
    %5 = arith.addf %2, %4 : vector<2x32xf32>
    %cst_5 = arith.constant 0.000000e+00 : f32
    %6 = vector.broadcast %cst_5 : f32 to vector<2x32xf32>
    %7 = arith.maximumf %5, %6 : vector<2x32xf32>
    %8 = arith.truncf %7 : vector<2x32xf32> to vector<2x32xbf16>
    %c0_6 = arith.constant 0 : index
    %c0_7 = arith.constant 0 : index
    %9 = vector.load %arg3[%c0_6, %c0_7] : memref<32x32xbf16, #tpu.memory_space<vmem>>, vector<32x32xbf16>
    %cst_8 = arith.constant dense<0.000000e+00> : vector<2x32xf32>
    %10 = tpu.matmul %8, %9, %cst_8 {dimension_numbers = #tpu.dot_dimension_numbers<[1], [0], [0], [1], [0, 0, 1, 1], [], []>} : vector<2x32xbf16>, vector<32x32xbf16>, vector<2x32xf32> -> vector<2x32xf32>
    %c0_9 = arith.constant 0 : index
    %c0_10 = arith.constant 0 : index
    %11 = vector.load %arg4[%c0_9, %c0_10] : memref<1x32xf32, #tpu.memory_space<vmem>>, vector<1x32xf32>
    %12 = vector.broadcast %11 : vector<1x32xf32> to vector<2x32xf32>
    %13 = arith.addf %10, %12 : vector<2x32xf32>
    %cst_11 = arith.constant 0.000000e+00 : f32
    %14 = vector.broadcast %cst_11 : f32 to vector<2x32xf32>
    %15 = arith.maximumf %13, %14 : vector<2x32xf32>
    %16 = arith.truncf %15 : vector<2x32xf32> to vector<2x32xbf16>
    %c0_12 = arith.constant 0 : index
    %c0_13 = arith.constant 0 : index
    %17 = vector.load %arg5[%c0_12, %c0_13] : memref<32x128xbf16, #tpu.memory_space<vmem>>, vector<32x128xbf16>
    %cst_14 = arith.constant dense<0.000000e+00> : vector<2x128xf32>
    %18 = tpu.matmul %16, %17, %cst_14 {dimension_numbers = #tpu.dot_dimension_numbers<[1], [0], [0], [1], [0, 0, 1, 1], [], []>} : vector<2x32xbf16>, vector<32x128xbf16>, vector<2x128xf32> -> vector<2x128xf32>
    %c0_15 = arith.constant 0 : index
    %c0_16 = arith.constant 0 : index
    %19 = vector.load %arg6[%c0_15, %c0_16] : memref<1x128xf32, #tpu.memory_space<vmem>>, vector<1x128xf32>
    %20 = vector.broadcast %19 : vector<1x128xf32> to vector<2x128xf32>
    %21 = arith.addf %18, %20 : vector<2x128xf32>
    %c0_17 = arith.constant 0 : index
    %c0_18 = arith.constant 0 : index
    %22 = vector.load %arg7[%c0_17, %c0_18] : memref<2x128xf32, #tpu.memory_space<vmem>>, vector<2x128xf32>
    tpu.vector_store %arg7[%c0_17, %c0_18], %21 {strides = array<i32>} : memref<2x128xf32, #tpu.memory_space<vmem>>, vector<2x128xf32>,
    return
  }
}

</mosaic_0001>

<bundles_post_ra>
// kernel: tpu_custom_call.1
= control target key start
LH: loop header
LB: loop body
LE: loop exit
PB: predicated region body
PF: predicated region fallthrough
CT: control target
= control target key end

     0   :  { %v139_v29 = vlaneseq  ;;  %v1036_v33 = vmov 1966171168   ;;  %v1037_v40 = vmov 0.0   ;;  %vm1038_vm0 = vmmov 0   ;;  %s1276_s0 = inlined_call_operand.vmem [shape: bf16[2,784], index: 0, kind: input, shape index: {}]   ;;  %s1277_s1 = inlined_call_operand.vmem [shape: bf16[784,32], index: 1, kind: input, shape index: {}]   ;;  %s1278_s2 = inlined_call_operand.vmem [shape: f32[1,32], index: 2, kind: input, shape index: {}]   ;;  %s1279_s3 = inlined_call_operand.vmem [shape: bf16[32,32], index: 3, kind: input, shape index: {}]   ;;  %s1280_s4 = inlined_call_operand.vmem [shape: f32[1,32], index: 4, kind: input, shape index: {}]   ;;  %s1281_s5 = inlined_call_operand.vmem [shape: bf16[32,128], index: 5, kind: input, shape index: {}]   ;;  %s1282_s6 = inlined_call_operand.vmem [shape: f32[1,128], index: 6, kind: input, shape index: {}]   ;;  %s1283_s7 = inlined_call_operand.hbm [shape: f32[2,128], index: 7, kind: output, shape index: {}]  }
   0x1   :  { %v958_v0 = vld [vmem:[%s1277_s1 + $0x40] sm:$0xff]   ;;  %v962_v4 = vld [vmem:[%s1277_s1 + $0x48] sm:$0xff]   ;;  %v966_v8 = vld [vmem:[%s1277_s1 + $0x50] sm:$0xff]   ;;  %v137_v34 = vunpack.c.l.s4 %v1036_v33  ;;  %vm483_vm1 = vcmask 130048  }
   0x2   :  { %v959_v1 = vld [vmem:[%s1277_s1] sm:$0xff]   ;;  %858 = vmatprep.subr.bf16.mxu0 %v958_v0  ;;  %v963_v5 = vld [vmem:[%s1277_s1 + $0x8] sm:$0xff]   ;;  %v967_v9 = vld [vmem:[%s1277_s1 + $0x10] sm:$0xff]   ;;  %v140_v35 = vshrl.u32 %v139_v29, 7 }
   0x3   :  { %v960_v2 = vld [vmem:[%s1277_s1 + $0xc0] sm:$0xff]   ;;  %859 = vmatpush3.bf16.msra.mxu0 %v959_v1  ;;  %v964_v6 = vld [vmem:[%s1277_s1 + $0xc8] sm:$0xff]   ;;  %v968_v10 = vld [vmem:[%s1277_s1 + $0xd0] sm:$0xff]   ;;  %v138_v39 = vunpack.c.0.s8 %v137_v34 }
   0x4   :  { %v961_v3 = vld [vmem:[%s1277_s1 + $0x80] sm:$0xff]   ;;  %880 = vmatprep.subr.bf16.mxu1 %v960_v2  ;;  %860 = vmatprep.subr.bf16.mxu0 %v962_v4  ;;  %v965_v7 = vld [vmem:[%s1277_s1 + $0x88] sm:$0xff]   ;;  %v969_v11 = vld [vmem:[%s1277_s1 + $0x90] sm:$0xff]  }
   0x5   :  { %881 = vmatpush3.bf16.msra.mxu1 %v961_v3  ;;  %v970_v12 = vld [vmem:[%s1277_s1 + $0x58] sm:$0xff]   ;;  %v974_v16 = vld [vmem:[%s1277_s1 + $0x60] sm:$0xff]   ;;  %v978_v20 = vld [vmem:[%s1277_s1 + $0x68] sm:$0xff]   ;;  %v141_v41 = vsub.s32 %v138_v39, %v140_v35 }
   0x6   :  { %882 = vmatprep.subr.bf16.mxu1 %v964_v6  ;;  %v971_v13 = vld [vmem:[%s1277_s1 + $0x18] sm:$0xff]   ;;  %v975_v17 = vld [vmem:[%s1277_s1 + $0x20] sm:$0xff]   ;;  %v979_v21 = vld [vmem:[%s1277_s1 + $0x28] sm:$0xff]  }
   0x7   :  { %861 = vmatpush3.bf16.msra.mxu0 %v963_v5  ;;  %v972_v14 = vld [vmem:[%s1277_s1 + $0xd8] sm:$0xff]   ;;  %v976_v18 = vld [vmem:[%s1277_s1 + $0xe0] sm:$0xff]   ;;  %v980_v22 = vld [vmem:[%s1277_s1 + $0xe8] sm:$0xff]  }
   0x8   :  { %862 = vmatprep.subr.bf16.mxu0 %v966_v8  ;;  %v973_v15 = vld [vmem:[%s1277_s1 + $0x98] sm:$0xff]   ;;  %v977_v19 = vld [vmem:[%s1277_s1 + $0xa0] sm:$0xff]   ;;  %v981_v23 = vld [vmem:[%s1277_s1 + $0xa8] sm:$0xff]  }
   0x9   :  { %883 = vmatpush3.bf16.msra.mxu1 %v965_v7  ;;  %v982_v24 = vld [vmem:[%s1277_s1 + $0x70] sm:$0xff]   ;;  %v986_v28 = vld [vmem:[%s1277_s1 + $0x78] sm:$0xff]   ;;  %v28_v32 = vld [vmem:[%s1276_s0] sm:$0x7f] }
   0xa   :  { %884 = vmatprep.subr.bf16.mxu1 %v968_v10  ;;  %v983_v25 = vld [vmem:[%s1277_s1 + $0x30] sm:$0xff]   ;;  %v987_v30 = vld [vmem:[%s1277_s1 + $0x38] sm:$0xff]   ;;  %v991_v37 = vld [vmem:[%s1277_s1 + $0x140] sm:$0xff]   ;;  %v135_v38 = vcombine.high %v28_v32, %v28_v32  ;;  %v142_v42 = vrot.slane %v28_v32, %v141_v41 }
   0xb   :  { %863 = vmatpush3.bf16.msra.mxu0 %v967_v9  ;;  %v984_v26 = vld [vmem:[%s1277_s1 + $0xf0] sm:$0xff]   ;;  %v988_v31 = vld [vmem:[%s1277_s1 + $0xf8] sm:$0xff]   ;;  %v992_v48 = vld [vmem:[%s1277_s1 + $0x100] sm:$0xff]  }
   0xc   :  { %864 = vmatprep.subr.bf16.mxu0 %v970_v12  ;;  %v985_v27 = vld [vmem:[%s1277_s1 + $0xb0] sm:$0xff]   ;;  %v990_v36 = vld [vmem:[%s1277_s1 + $0xb8] sm:$0xff]   ;;  %v149_v43 = vrot.slane %v135_v38, %v141_v41  ;;  %v150_v44 = vcombine.high %v142_v42, %v142_v42  ;;  %v158_v45 = vrot.slane %v142_v42, %v141_v41  ;;  %v993_v50 = vld [vmem:[%s1277_s1 + $0x148] sm:$0xff]  }
   0xd   :  { %885 = vmatpush3.bf16.msra.mxu1 %v969_v11  ;;  %v994_v53 = vld [vmem:[%s1277_s1 + $0x108] sm:$0xff]   ;;  %v995_v54 = vld [vmem:[%s1277_s1 + $0x150] sm:$0xff]   ;;  %v997_v57 = vld [vmem:[%s1277_s1 + $0x158] sm:$0xff]  }
   0xe   :  { %886 = vmatprep.subr.bf16.mxu1 %v972_v14  ;;  %v151_v46 = vcombine.high %v149_v43, %v149_v43  ;;  %v172_v47 = vrot.slane %v150_v44, %v141_v41  ;;  %v180_v49 = vcombine.high %v158_v45, %v158_v45  ;;  %v165_v55 = vrot.slane %v149_v43, %v141_v41  ;;  %v996_v56 = vld [vmem:[%s1277_s1 + $0x110] sm:$0xff]   ;;  %v1007_v58 = vld [vmem:[%s1277_s1 + $0x180] sm:$0xff]  }
   0xf   :  { %865 = vmatpush3.bf16.msra.mxu0 %v971_v13 }
  0x10   :  { %866 = vmatprep.subr.bf16.mxu0 %v974_v16  ;;  %519 = vmatprep.mubr.bf16.mxu0 %v172_v47  ;;  %v182_v51 = vcombine.high %v172_v47, %v172_v47  ;;  %v179_v52 = vrot.slane %v151_v46, %v141_v41  ;;  %v181_v59 = vcombine.high %v165_v55, %v165_v55 }
  0x11   :  { %887 = vmatpush3.bf16.msra.mxu1 %v973_v15 }
  0x12   :  { %888 = vmatprep.subr.bf16.mxu1 %v976_v18  ;;  %559 = vmatprep.mubr.bf16.mxu1 %v182_v51 }
  0x13   :  { %867 = vmatpush3.bf16.msra.mxu0 %v975_v17 }
  0x14   :  { %868 = vmatprep.subr.bf16.mxu0 %v978_v20 }
  0x15   :  { %889 = vmatpush3.bf16.msra.mxu1 %v977_v19 }
  0x16   :  { %890 = vmatprep.subr.bf16.mxu1 %v980_v22 }
  0x17   :  { %869 = vmatpush3.bf16.msra.mxu0 %v979_v21 }
  0x18   :  { %870 = vmatprep.subr.bf16.mxu0 %v982_v24 }
  0x19   :  { %891 = vmatpush3.bf16.msra.mxu1 %v981_v23 }
  0x1a   :  { %892 = vmatprep.subr.bf16.mxu1 %v984_v26 }
  0x1b   :  { %871 = vmatpush3.bf16.msra.mxu0 %v983_v25 }
  0x1c   :  { %872 = vmatprep.subr.bf16.mxu0 %v986_v28 }
  0x1d   :  { %893 = vmatpush3.bf16.msra.mxu1 %v985_v27 }
  0x1e   :  { %894 = vmatprep.subr.bf16.mxu1 %v988_v31 }
  0x1f   :  { %873 = vmatpush3.bf16.msra.mxu0 %v987_v30 }
  0x20   :  { %902 = vmatprep.subr.bf16.mxu0 %v991_v37 }
  0x21   :  { %895 = vmatpush3.bf16.msra.mxu1 %v990_v36 }
  0x22   :  { %932 = vmatprep.subr.bf16.mxu1 %v1037_v40  ;;  %520 = vmatmul.mubr.bf16.vlgmr.msra.gmra.mrb[0].mxu0 %v158_v45 }
  0x23   :  { %903 = vmatpush3.bf16.msra.mxu0 %v992_v48  ;;  %599 = vmatprep.mubr.bf16.mxu0 %v179_v52 }
  0x24   :  { %560 = vmatmul.mubr.bf16.vlgmr.msra.gmra.mrb[0].mxu1 %v180_v49  ;;  %904 = vmatprep.subr.bf16.mxu0 %v993_v50 }
  0x25   :  { %934 = vmatprep.mubr.msk.bf16.mxu1 %vm1038_vm0, %v1037_v40  ;;  %933 = vmatpush3.bf16.msra.mxu1 %v1007_v58 }
  0x26   :  { %938 = vmatprep.subr.bf16.mxu1 %v1037_v40 }
  0x27   :  { %905 = vmatpush3.bf16.msra.mxu0 %v994_v53 }
  0x28   :  { %906 = vmatprep.subr.bf16.mxu0 %v995_v54 }
  0x29   :  { %12 = vsyncpa [#allocation3], 0  ;;  %v998_v60 = vld [vmem:[%s1277_s1 + $0x118] sm:$0xff]   ;;  %v999_v61 = vld [vmem:[%s1277_s1 + $0x160] sm:$0xff]   ;;  %vm672_vm2 = vcmask 261120   ;;  %s1039_s18 = smov [#allocation2]  }
  0x2a   :  { %v1000_v62 = vld [vmem:[%s1277_s1 + $0x120] sm:$0xff]   ;;  %v1001_v63 = vld [vmem:[%s1277_s1 + $0x168] sm:$0xff]   ;;  %v1003_v1 = vld [vmem:[%s1277_s1 + $0x170] sm:$0xff]  }
  0x2b   :  { %907 = vmatpush3.bf16.msra.mxu0 %v996_v56  ;;  %v1002_v0 = vld [vmem:[%s1277_s1 + $0x128] sm:$0xff]   ;;  %v1004_v2 = vld [vmem:[%s1277_s1 + $0x130] sm:$0xff]   ;;  %v1005_v3 = vld [vmem:[%s1277_s1 + $0x178] sm:$0xff]  }
  0x2c   :  { %908 = vmatprep.subr.bf16.mxu0 %v997_v57  ;;  %935 = vmatmul.mubr.msk.bf16.vlgmr.msra.gmra.mrb[4].mxu1 %vm483_vm1, %v181_v59  ;;  %v1006_v4 = vld [vmem:[%s1277_s1 + $0x138] sm:$0xff]   ;;  %v1008_v5 = vld [vmem:[%s1279_s3] sm:$0xff]   ;;  %v1009_v6 = vld [vmem:[%s1279_s3 + $0x8] sm:$0xff]  }
  0x2d   :  { %942 = vmatprep.mubr.msk.bf16.mxu1 %vm1038_vm0, %v1037_v40  ;;  %939 = vmatpush3.bf16.msra.mxu1 %v1008_v5  ;;  %v799_v8 = vld [vmem:[%s1278_s2] ss:$0 sm:$0xff]  ;;  %v1011_v34 = vld [vmem:[%s1281_s5 + $0x8] sm:$0xff]  }
  0x2e   :  { %940 = vmatprep.subr.bf16.mxu1 %v1037_v40  ;;  %v1010_v32 = vld [vmem:[%s1281_s5] sm:$0xff]   ;;  %s791_s5 = sshll.u32 %s1039_s18, 4  ;;  %s792_s5 = int_to_ptr.vmem [resolvable:$true] %s791_s5 }
  0x2f   :  { %909 = vmatpush3.bf16.msra.mxu0 %v998_v60  ;;  %v850_v35 = vld [vmem:[%s1280_s4] ss:$0 sm:$0xff]  ;;  %s1012_s4 = scalar_lea.vmem %s792_s5, 32  ;;  %p1017_p1 = scmp.lt.s32.totalorder %s792_s5, %s792_s5 }
  0x30   :  { %910 = vmatprep.subr.bf16.mxu0 %v999_v61  ;;  %p1013_p0 = scmp.ne.s32.totalorder %s792_s5, %s1012_s4  ;;  %p1018_p2 = scmp.lt.s32.totalorder %s1012_s4, %s1012_s4 }
  0x31   :  { %941 = vmatpush3.bf16.msra.mxu1 %v1009_v6 }
  0x32   :  { %946 = vmatprep.subr.bf16.mxu1 %v1037_v40  ;;  %p1019_p3 = por %p1018_p2, %p1017_p1 }
  0x33   :  { %911 = vmatpush3.bf16.msra.mxu0 %v1000_v62 }
  0x34   :  { %912 = vmatprep.subr.bf16.mxu0 %v1001_v63  ;;  %p1020_p4 = pnand %p1019_p3, %p1013_p0 }
  0x37   :  { %913 = vmatpush3.bf16.msra.mxu0 %v1002_v0 }
  0x38   :  { %914 = vmatprep.subr.bf16.mxu0 %v1003_v1 }
  0x3b   :  { %915 = vmatpush3.bf16.msra.mxu0 %v1004_v2 }
  0x3c   :  { %916 = vmatprep.subr.bf16.mxu0 %v1005_v3 }
  0x3f   :  { %917 = vmatpush3.bf16.msra.mxu0 %v1006_v4 }
  0x42   :  { %600 = vmatmul.mubr.bf16.vlgmr.msra.gmra.mrb[4].mxu0 %v165_v55 }
  0xf5   :  { %v874_v7 = vpop.f32.mrb[0].mxu0 }
  0xf6   :  { %v875_v9 = vpop.f32.mrb[1].mxu0 }
  0xf7   :  { %v876_v10 = vadd.f32 %v875_v9, %v874_v7  ;;  %v877_v11 = vpop.f32.mrb[2].mxu0  ;;  %v896_v12 = vpop.f32.mrb[0].mxu1 }
  0xf8   :  { %v878_v13 = vpop.f32.mrb[3].mxu0  ;;  %v897_v14 = vpop.f32.mrb[1].mxu1 }
  0xf9   :  { %v522_v15 = vadd.f32 %v876_v10, %v799_v8  ;;  %v898_v16 = vadd.f32 %v897_v14, %v896_v12  ;;  %v899_v17 = vpop.f32.mrb[2].mxu1 }
  0xfa   :  { %v900_v18 = vpop.f32.mrb[3].mxu1 }
  0xfb   :  { %v562_v19 = vadd.f32 %v898_v16, %v522_v15 }
  0xff   :  { %v641_v20 = vpop.f32.mrb[4].mxu1 }
 0x100   :  { %v936_v21 = vpop.f32.mrb[5].mxu1 }
 0x101   :  { %v644_v22 = vpop.f32.mrb[6].mxu1 }
 0x102   :  { %v937_v23 = vpop.f32.mrb[7].mxu1 }
 0x115   :  { %v918_v24 = vpop.f32.mrb[4].mxu0 }
 0x116   :  { %v919_v25 = vpop.f32.mrb[5].mxu0 }
 0x117   :  { %v920_v26 = vadd.f32 %v919_v25, %v918_v24  ;;  %v921_v27 = vpop.f32.mrb[6].mxu0 }
 0x118   :  { %v922_v28 = vpop.f32.mrb[7].mxu0 }
 0x119   :  { %v602_v29 = vadd.f32 %v920_v26, %v562_v19 }
 0x11b   :  { %v642_v30 = vadd.f32 %v641_v20, %v602_v29 }
 0x11d   :  { %v647_v31 = vmax.f32 %v642_v30, 0.0 }
 0x11f   :  { %v648_v33 = vpack.c.bf16 %v647_v31, %v647_v31 }
 0x121   :  { %943 = vmatmul.mubr.msk.bf16.vlgmr.msra.gmra.mrb[8].mxu1 %vm672_vm2, %v648_v33 }
 0x122   :  { %947 = vmatpush3.bf16.msra.mxu1 %v1010_v32  ;;  %950 = vmatprep.mubr.msk.bf16.mxu1 %vm1038_vm0, %v1037_v40 }
 0x123   :  { %948 = vmatprep.subr.bf16.mxu1 %v1037_v40  ;;  %v854_v40 = vld [vmem:[%s1282_s6] ss:$0 sm:$0xff] }
 0x126   :  { %949 = vmatpush3.bf16.msra.mxu1 %v1011_v34 }
 0x1f4   :  { %v710_v36 = vpop.f32.mrb[8].mxu1 }
 0x1f5   :  { %v711_v37 = vadd.f32 %v850_v35, %v710_v36  ;;  %v944_v38 = vpop.f32.mrb[9].mxu1 }
 0x1f6   :  { %v713_v39 = vpop.f32.mrb[10].mxu1 }
 0x1f7   :  { %v716_v41 = vmax.f32 %v711_v37, 0.0  ;;  %v945_v42 = vpop.f32.mrb[11].mxu1 }
 0x1f9   :  { %v717_v43 = vpack.c.bf16 %v716_v41, %v716_v41 }
 0x1fb   :  { %951 = vmatmul.mubr.msk.bf16.vlgmr.msra.gmra.mrb[12].mxu1 %vm672_vm2, %v717_v43 }
 0x2ce   :  { %v778_v44 = vpop.f32.mrb[12].mxu1 }
 0x2cf   :  { %v779_v45 = vadd.f32 %v854_v40, %v778_v44  ;;  %v952_v46 = vpop.f32.mrb[13].mxu1 }
 0x2d0   :  { %v781_v47 = vpop.f32.mrb[14].mxu1 }
 0x2d1   :  { %784 = vst [vmem:[#allocation2] sm:$0x3] %v779_v45  ;;  %v953_v48 = vpop.f32.mrb[15].mxu1 }
 0x2d2   :  { %1023 = shalt.err (!%p1020_p4)
}
 0x2d3   :  { %s1024_s6 = scalar_lea.hbm %s1283_s7, 32 }
 0x2d4   :  { %p1025_p5 = scmp.ne.s32.totalorder %s1283_s7, %s1024_s6  ;;  %p1028_p6 = scmp.lt.u32.totalorder %s1024_s6, %s1283_s7 }
 0x2d6   :  { %p1030_p7 = pnand %p1028_p6, %p1025_p5 }
 0x2d8   :  { %1033 = shalt.err (!%p1030_p7)
}
 0x2d9   :  { %794 = dma.vmem_to_hbm [thread:$0]  %s792_s5, 32, %s1283_s7, [#allocation3]  }
 0x2da   :  { %1034 = dma.done.wait [#allocation3], 32  }
 0x2db   :  { %1035 = vsyncadd [#allocation3], 4294967264 }
 0x2dc   :  { %798 = vsyncpa [#allocation3], 1 }

</bundles_post_ra>
